<compile_context>
chip_gen: v6e
topology: v6e:2x2x1
jax: 0.10.0
libtpu: 0.0.40
codegen_flags: <defaults>
</compile_context>

<pallas_src>
import jax
import jax.numpy as jnp
from jax.experimental import pallas as pl
from jax.experimental.pallas import tpu as pltpu

LANES = 128
TARGET_GRID = 8              # aim for ~8 grid steps: pipelining + both v7x TensorCores
MAX_BLOCK_BYTES = 1 << 20    # 1 MiB / tile  -> 2 arrays x 2 buffers = 4 MiB VMEM (safe on v5e)
MIN_BLOCK_BYTES = 256 << 10  # 256 KiB floor so the ~0.35 us per-step overhead stays <~10%


def _sublane_pack(dtype):
    """Sublane packing granule for a dtype: (8,128) f32, (16,128) bf16/f16, (32,128) int8/fp8."""
    itemsize = jnp.dtype(dtype).itemsize
    if itemsize >= 4:
        return 8
    if itemsize == 2:
        return 16
    return 32


def _scaled_softsign_kernel(params_ref, x_ref, o_ref):
    # params_ref: SMEM f32[2] = (alpha, beta + eps); x_ref / o_ref: VMEM tiles (input dtype).
    alpha = params_ref[0]
    beta_eps = params_ref[1]
    x = x_ref[...].astype(jnp.float32)
    o_ref[...] = (alpha * x / (beta_eps + jnp.abs(x))).astype(o_ref.dtype)


def _choose_block_rows(rows, pack, itemsize):
    """Pick block_rows: pack-aligned, byte-bounded [MIN, MAX], ~TARGET_GRID steps, <= rows."""
    row_bytes = LANES * itemsize
    max_rows = max(pack, (MAX_BLOCK_BYTES // row_bytes) // pack * pack)
    min_rows = max(pack, (MIN_BLOCK_BYTES // row_bytes) // pack * pack)
    target = pl.cdiv(rows, TARGET_GRID)
    target = pl.cdiv(target, pack) * pack
    block_rows = max(min_rows, min(max_rows, target))
    block_rows = min(block_rows, rows)       # rows is already a multiple of pack
    return max(pack, block_rows)


def scaled_soft_sign(x, alpha, beta, eps=1e-8):
    """Elementwise ScaledSoftSign via a Pallas TPU kernel.

    x: any-shape array (e.g. NCHW, any float dtype); alpha, beta: scalar parameters shape (1,).
    """
    orig_shape = x.shape
    orig_dtype = x.dtype
    total = x.size
    pack = _sublane_pack(orig_dtype)
    itemsize = jnp.dtype(orig_dtype).itemsize

    # Flatten to a lane-dense (rows, 128) slab; rows rounded up to the dtype sublane pack.
    # Pad is at most pack*128 trailing elements (zeros -> 0/(beta+eps)=0, sliced off below).
    rows = pl.cdiv(total, LANES)
    rows = pl.cdiv(rows, pack) * pack
    padded_total = rows * LANES

    x_flat = jnp.reshape(x, (-1,))
    needs_pad = padded_total != total
    if needs_pad:
        x_flat = jnp.pad(x_flat, (0, padded_total - total))
    x2d = jnp.reshape(x_flat, (rows, LANES))

    block_rows = _choose_block_rows(rows, pack, itemsize)
    # Last block may be ragged (block_rows need not divide rows); Pallas masks the OOB rows.
    grid = (pl.cdiv(rows, block_rows),)

    # Fold (beta + eps) into one scalar; both live as f32 in SMEM, read once per tile.
    params = jnp.stack([
        jnp.asarray(alpha, jnp.float32).reshape(-1)[0],
        jnp.asarray(beta, jnp.float32).reshape(-1)[0] + jnp.float32(eps),
    ])

    out2d = pl.pallas_call(
        _scaled_softsign_kernel,
        out_shape=jax.ShapeDtypeStruct((rows, LANES), orig_dtype),
        grid_spec=pltpu.PrefetchScalarGridSpec(
            num_scalar_prefetch=0,
            grid=grid,
            in_specs=[
                pl.BlockSpec(memory_space=pltpu.MemorySpace.SMEM),   # (alpha, beta+eps)
                pl.BlockSpec((block_rows, LANES), lambda i: (i, 0)),
            ],
            out_specs=pl.BlockSpec((block_rows, LANES), lambda i: (i, 0)),
        ),
        compiler_params=pltpu.CompilerParams(
            dimension_semantics=("parallel",),
        ),
    )(params, x2d)

    if needs_pad:
        out_flat = jnp.reshape(out2d, (-1,))[:total]
        return jnp.reshape(out_flat, orig_shape)
    return jnp.reshape(out2d, orig_shape)


class ScaledSoftSignPallas:
    """Mirror of the PyTorch ScaledSoftSign module: alpha, beta initialized to 1.0, eps=1e-8."""

    def __init__(self):
        self.alpha = jnp.ones((1,), dtype=jnp.float32)
        self.beta = jnp.ones((1,), dtype=jnp.float32)
        self.eps = 1e-8

    def __call__(self, x):
        return scaled_soft_sign(x, self.alpha, self.beta, self.eps)


if __name__ == "__main__":
    key = jax.random.PRNGKey(0)
    mod = ScaledSoftSignPallas()

    # Primary check: NCHW input, small shape (exactly fills (16, 128) -> no pad, no slice).
    x = jax.random.normal(key, (2, 4, 16, 16), dtype=jnp.float32) * 3.0
    out = jax.block_until_ready(mod(x))
    ref = mod.alpha[0] * x / (mod.beta[0] + jnp.abs(x) + mod.eps)
    assert out.shape == x.shape and out.dtype == x.dtype
    assert jnp.allclose(out, ref, atol=1e-6, rtol=1e-6), "mismatch vs reference (aligned case)"

    # Secondary check: awkward shape exercising the trailing-pad + ragged-slice path.
    x2 = jax.random.normal(jax.random.PRNGKey(1), (3, 5, 7, 11), dtype=jnp.float32) * 2.0
    out2 = jax.block_until_ready(mod(x2))
    ref2 = mod.alpha[0] * x2 / (mod.beta[0] + jnp.abs(x2) + mod.eps)
    assert out2.shape == x2.shape and out2.dtype == x2.dtype
    assert jnp.allclose(out2, ref2, atol=1e-6, rtol=1e-6), "mismatch vs reference (ragged case)"

    print("KERNEL_OK")
</pallas_src>

<mosaic_0001>
module attributes {stable_mosaic.version = 11 : i64} {
  func.func @_scaled_softsign_kernel(%arg0: i32, %arg1: memref<2xf32, #tpu.memory_space<smem>>, %arg2: memref<16x128xf32, #tpu.memory_space<vmem>>, %arg3: memref<16x128xf32, #tpu.memory_space<vmem>>) attributes {dimension_semantics = [#tpu.dimension_semantics<parallel>], iteration_bounds = array<i64: 1>, scalar_prefetch = 0 : i64, scratch_operands = 0 : i64, tpu.core_type = #tpu.core_type<tc>, window_params = [{transform_indices = @transform_0, window_bounds = array<i64: 2>}, {transform_indices = @transform_1, window_bounds = array<i64: 16, 128>}, {transform_indices = @transform_2, window_bounds = array<i64: 16, 128>}]} {
    %c0 = arith.constant 0 : index
    %0 = memref.load %arg1[%c0] : memref<2xf32, #tpu.memory_space<smem>>
    %c1 = arith.constant 1 : index
    %1 = memref.load %arg1[%c1] : memref<2xf32, #tpu.memory_space<smem>>
    %c0_0 = arith.constant 0 : index
    %c0_1 = arith.constant 0 : index
    %2 = vector.load %arg2[%c0_0, %c0_1] : memref<16x128xf32, #tpu.memory_space<vmem>>, vector<16x128xf32>
    %3 = vector.broadcast %0 : f32 to vector<16x128xf32>
    %4 = arith.mulf %3, %2 : vector<16x128xf32>
    %5 = math.absf %2 : vector<16x128xf32>
    %6 = vector.broadcast %1 : f32 to vector<16x128xf32>
    %7 = arith.addf %6, %5 : vector<16x128xf32>
    %8 = arith.divf %4, %7 : vector<16x128xf32>
    %c0_2 = arith.constant 0 : index
    %c0_3 = arith.constant 0 : index
    %9 = vector.load %arg3[%c0_2, %c0_3] : memref<16x128xf32, #tpu.memory_space<vmem>>, vector<16x128xf32>
    tpu.vector_store %arg3[%c0_2, %c0_3], %8 {strides = array<i32>} : memref<16x128xf32, #tpu.memory_space<vmem>>, vector<16x128xf32>,
    return
  }
  func.func @transform_0(%arg0: i32) -> i32 {
    %c0_i32 = arith.constant 0 : i32
    %c0_i32_0 = arith.constant 0 : i32
    return %c0_i32 : i32
  }
  func.func @transform_1(%arg0: i32) -> (i32, i32) {
    %c0_i32 = arith.constant 0 : i32
    %c0_i32_0 = arith.constant 0 : i32
    return %arg0, %c0_i32 : i32, i32
  }
  func.func @transform_2(%arg0: i32) -> (i32, i32) {
    %c0_i32 = arith.constant 0 : i32
    %c0_i32_0 = arith.constant 0 : i32
    return %arg0, %c0_i32 : i32, i32
  }
}

</mosaic_0001>

<bundles_post_ra>
// kernel: tpu_custom_call.1
= control target key start
LH: loop header
LB: loop body
LE: loop exit
PB: predicated region body
PF: predicated region fallthrough
CT: control target
= control target key end

     0   :  { %7 = vsyncpa [#allocation5], 0  ;;  %s172_s0 = inlined_call_operand.hbm [shape: f32[2], index: 0, kind: input, shape index: {}]   ;;  %s173_s1 = inlined_call_operand.hbm [shape: f32[16,128], index: 1, kind: input, shape index: {}]   ;;  %s174_s2 = inlined_call_operand.hbm [shape: f32[16,128], index: 2, kind: output, shape index: {}]  }
   0x1   :  { %8 = vsyncpa [#allocation3], 0 }
   0x2   :  { %9 = vsyncpa [#allocation4], 0  ;;  %s137_s9 = smov [#allocation2]   ;;  %s138_s12 = smov [#allocation6]  }
   0x3   :  { %17 = dma.hbm_to_smem %s172_s0, 16, %s137_s9, [#allocation5]  }
   0x4   :  { %s23_s13 = sshll.u32 %s138_s12, 4  ;;  %s24_s13 = int_to_ptr.vmem [resolvable:$true] %s23_s13 }
   0x5   :  { %s99_s14 = scalar_lea.vmem %s24_s13, 256  ;;  %p104_p1 = scmp.lt.s32.totalorder %s24_s13, %s24_s13 }
   0x6   :  { %p100_p0 = scmp.ne.s32.totalorder %s24_s13, %s99_s14  ;;  %p105_p2 = scmp.lt.s32.totalorder %s99_s14, %s99_s14 }
   0x8   :  { %p106_p3 = por %p105_p2, %p104_p1 }
   0xa   :  { %p107_p4 = pnand %p106_p3, %p100_p0 }
   0xc   :  { %110 = shalt.err (!%p107_p4)
}
   0xd   :  { %s139_s15 = smov 128   ;;  %s140_s16 = smov 8  }
   0xe   :  { %29 = dma.hbm_to_vmem [thread:$0]  %s173_s1, 256, %s24_s13, [#allocation3], %s139_s15, %s139_s15, %s140_s16  }
   0xf   :  { %131 = dma.done.wait [#allocation5], 16  }
  0x10   :  { %132 = vsyncadd [#allocation5], 4294967280 }
  0x11   :  { %133 = dma.done.wait [#allocation3], 256  }
  0x12   :  { %134 = vsyncadd [#allocation3], 4294967040 }
  0x13   :  { %36 = sfence }
  0x14   :  { %s73_s0 = sld [smem:[#allocation2 + $0x1]]  ;;  %v39_v0 = vld [vmem:[#allocation6] sm:$0xff]  ;;  %v40_v1 = vld [vmem:[#allocation6 + $0x8] sm:$0xff]  ;;  %s141_s1 = smov [#allocation7]  }
  0x15   :  { %v44_v2 = vand.u32 2147483647, %v39_v0  ;;  %v45_v3 = vand.u32 2147483647, %v40_v1  ;;  %s37_s19 = sld [smem:[#allocation2]]  ;;  %s60_s20 = sshll.u32 %s141_s1, 4  ;;  %s61_s20 = int_to_ptr.vmem [resolvable:$true] %s60_s20 }
  0x16   :  { %s111_s21 = scalar_lea.vmem %s61_s20, 256  ;;  %p116_p6 = scmp.lt.s32.totalorder %s61_s20, %s61_s20 }
  0x17   :  { %p112_p5 = scmp.ne.s32.totalorder %s61_s20, %s111_s21  ;;  %p117_p7 = scmp.lt.s32.totalorder %s111_s21, %s111_s21 }
  0x19   :  { %p118_p8 = por %p117_p7, %p116_p6 }
  0x1a   :  { %v46_v4 = vstv %s73_s0 }
  0x1b   :  { %v47_v5 = vadd.f32 %v46_v4, %v44_v2  ;;  %v48_v6 = vadd.f32 %v46_v4, %v45_v3  ;;  %v41_v7 = vstv %s37_s19  ;;  %p119_p9 = pnand %p118_p8, %p112_p5 }
  0x1c   :  { %v42_v8 = vmul.f32 %v41_v7, %v39_v0  ;;  %v43_v9 = vmul.f32 %v41_v7, %v40_v1 }
  0x1d   :  { %79 = vrcp.f32 %v47_v5 }
  0x1e   :  { %81 = vrcp.f32 %v48_v6 }
  0x2a   :  { %v80_v10 = vpop.eup %79 }
  0x2b   :  { %v82_v11 = vpop.eup %81  ;;  %v50_v12 = vmul.f32 %v80_v10, %v42_v8 }
  0x2c   :  { %v52_v13 = vmul.f32 %v82_v11, %v43_v9 }
  0x2d   :  { %53 = vst [vmem:[#allocation7] sm:$0xff] %v50_v12 }
  0x2e   :  { %54 = vst [vmem:[#allocation7 + $0x8] sm:$0xff] %v52_v13 }
  0x2f   :  { %122 = shalt.err (!%p119_p9)
}
  0x30   :  { %66 = dma.vmem_to_hbm [thread:$0]  %s61_s20, 256, %s174_s2, [#allocation4], %s139_s15, %s139_s15, %s140_s16  }
  0x31   :  { %135 = dma.done.wait [#allocation4], 256  }
  0x32   :  { %136 = vsyncadd [#allocation4], 4294967040 }
  0x33   :  { %70 = vsyncpa [#allocation3], 1 }
  0x34   :  { %71 = vsyncpa [#allocation4], 1 }
  0x35   :  { %72 = vsyncpa [#allocation5], 1 }

</bundles_post_ra>
